<compile_context>
chip_gen: v7x
topology: tpu7x:2x2x1
jax: 0.10.0
libtpu: 0.0.40
codegen_flags: <defaults>
</compile_context>

<pallas_src>
import functools

import jax
import jax.numpy as jnp
import numpy as np
from jax.experimental import pallas as pl
from jax.experimental.pallas import tpu as pltpu

LANE = 128
SUBLANE = 8


def _round_up(a, b):
    return ((a + b - 1) // b) * b


# ----------------------------------------------------------------------------
# Deterministic "orthogonal" init mimicking nn.init.orthogonal_ (QR of Gaussian)
# ----------------------------------------------------------------------------
def orthogonal_init(key, out_features, in_features, dtype=jnp.float32):
    """Returns a torch-style (out, in) semi-orthogonal weight matrix."""
    rows, cols = out_features, in_features
    n = max(rows, cols)
    m = min(rows, cols)
    a = jax.random.normal(key, (n, m), dtype=jnp.float32)
    q, r = jnp.linalg.qr(a)
    d = jnp.diagonal(r)
    s = jnp.where(d == 0, 1.0, jnp.sign(d))  # avoid zeroing a column when d==0
    q = q * s[None, :]
    w = q if rows >= cols else q.T
    return w.astype(dtype)  # shape (out, in)


# ----------------------------------------------------------------------------
# Pallas kernel: fused 3-layer MLP (two ReLUs) over a batch tile
# ----------------------------------------------------------------------------
def _mlp_kernel(x_ref, w1_ref, b1_ref, w2_ref, b2_ref, w3_ref, b3_ref, o_ref):
    x = x_ref[...]                                            # (tm, 1)
    # Layer 1: in_features == 1 -> outer product on the VPU (broadcast FMA),
    # keeping the MXU free for layers 2 and 3.
    h1 = jnp.maximum(x * w1_ref[...] + b1_ref[...], 0.0)      # (tm, H1p)
    h2 = jnp.dot(h1, w2_ref[...], preferred_element_type=jnp.float32) + b2_ref[...]
    h2 = jnp.maximum(h2, 0.0)                                 # (tm, H2p)
    out = jnp.dot(h2, w3_ref[...], preferred_element_type=jnp.float32) + b3_ref[...]
    o_ref[...] = out.astype(o_ref.dtype)                      # (tm, Qp) lane-dense


@functools.partial(jax.jit, static_argnames=("tm",))
def quantile_perceptron_forward(x, w1, b1, w2, b2, w3, b3, *, tm=512):
    """x: (N, 1) f32.  w*: (in, out) f32, b*: (1, out) f32.  Returns (N, Q) f32."""
    N = x.shape[0]
    H1 = w1.shape[1]
    H2 = w2.shape[1]
    Q = w3.shape[1]

    # Lane-dense padded widths (zero-padded columns stay zero through ReLU).
    H1p = _round_up(H1, LANE)
    H2p = _round_up(H2, LANE)
    Qp = _round_up(Q, LANE)

    def pad_to(a, shape):
        return jnp.pad(a, [(0, t - s) for s, t in zip(a.shape, shape)])

    w1p = pad_to(w1, (1, H1p))
    b1p = pad_to(b1, (1, H1p))
    w2p = pad_to(w2, (H1p, H2p))
    b2p = pad_to(b2, (1, H2p))
    w3p = pad_to(w3, (H2p, Qp))
    b3p = pad_to(b3, (1, Qp))

    # Batch tile: large for throughput, but never larger than the (8-aligned)
    # padded batch; pad the batch so the grid divides evenly.
    tm_eff = min(tm, _round_up(N, SUBLANE))
    N_pad = _round_up(N, tm_eff)
    x_pad = pad_to(x, (N_pad, 1))

    grid = (N_pad // tm_eff,)

    def const2(i):
        return (0, 0)

    out_padded = pl.pallas_call(
        _mlp_kernel,
        out_shape=jax.ShapeDtypeStruct((N_pad, Qp), jnp.float32),
        grid_spec=pl.GridSpec(
            grid=grid,
            in_specs=[
                pl.BlockSpec((tm_eff, 1), lambda i: (i, 0)),   # x tile
                pl.BlockSpec((1, H1p), const2),                # w1 row (1, H1p)
                pl.BlockSpec((1, H1p), const2),                # b1
                pl.BlockSpec((H1p, H2p), const2),              # w2
                pl.BlockSpec((1, H2p), const2),                # b2
                pl.BlockSpec((H2p, Qp), const2),               # w3
                pl.BlockSpec((1, Qp), const2),                 # b3
            ],
            out_specs=pl.BlockSpec((tm_eff, Qp), lambda i: (i, 0)),
        ),
        compiler_params=pltpu.CompilerParams(
            dimension_semantics=("parallel",),
        ),
    )(x_pad, w1p, b1p, w2p, b2p, w3p, b3p)

    return out_padded[:N, :Q]


# ----------------------------------------------------------------------------
# Pure-JAX reference (mirrors the torch forward exactly)
# ----------------------------------------------------------------------------
def reference_forward(x, w1, b1, w2, b2, w3, b3):
    h1 = jnp.maximum(x @ w1 + b1, 0.0)
    h2 = jnp.maximum(h1 @ w2 + b2, 0.0)
    return h2 @ w3 + b3


if __name__ == "__main__":
    # Small, forward-implied shapes
    N_HIDDEN1 = 32
    N_HIDDEN2 = 32
    quantiles = np.array([0.05, 0.1, 0.25, 0.5, 0.75, 0.9, 0.95, 0.99],
                         dtype=np.float32)
    NUM_Q = len(quantiles)
    BATCH = 16          # 1-D input: x is (n, 1)

    key = jax.random.PRNGKey(0)
    k_x, k1, k2, k3 = jax.random.split(key, 4)

    # torch-style (out, in) orthogonal weights, zero biases -> transpose to (in, out)
    w1_t = orthogonal_init(k1, N_HIDDEN1, 1)            # (H1, 1)
    w2_t = orthogonal_init(k2, N_HIDDEN2, N_HIDDEN1)    # (H2, H1)
    w3_t = orthogonal_init(k3, NUM_Q, N_HIDDEN2)        # (Q, H2)

    w1 = w1_t.T                                         # (1, H1)
    w2 = w2_t.T                                         # (H1, H2)
    w3 = w3_t.T                                         # (H2, Q)
    b1 = jnp.zeros((1, N_HIDDEN1), jnp.float32)
    b2 = jnp.zeros((1, N_HIDDEN2), jnp.float32)
    b3 = jnp.zeros((1, NUM_Q), jnp.float32)

    x = jax.random.normal(k_x, (BATCH, 1), dtype=jnp.float32)

    out = quantile_perceptron_forward(x, w1, b1, w2, b2, w3, b3)
    out = jax.block_until_ready(out)

    ref = reference_forward(x, w1, b1, w2, b2, w3, b3)

    assert out.shape == (BATCH, NUM_Q), out.shape
    np.testing.assert_allclose(np.asarray(out), np.asarray(ref),
                               rtol=1e-5, atol=1e-5)

    # TODO(synk): loss_fn (pinball loss) is training-only and not part of
    # forward(); it is not implemented as a kernel.
    print("KERNEL_OK")
</pallas_src>

<mosaic_0001>
module attributes {stable_mosaic.version = 11 : i64} {
  func.func @_mlp_kernel(%arg0: i32, %arg1: memref<16x1xf32, #tpu.memory_space<vmem>>, %arg2: memref<1x128xf32, #tpu.memory_space<vmem>>, %arg3: memref<1x128xf32, #tpu.memory_space<vmem>>, %arg4: memref<128x128xf32, #tpu.memory_space<vmem>>, %arg5: memref<1x128xf32, #tpu.memory_space<vmem>>, %arg6: memref<128x128xf32, #tpu.memory_space<vmem>>, %arg7: memref<1x128xf32, #tpu.memory_space<vmem>>, %arg8: memref<16x128xf32, #tpu.memory_space<vmem>>) attributes {dimension_semantics = [#tpu.dimension_semantics<parallel>], iteration_bounds = array<i64: 1>, scalar_prefetch = 0 : i64, scratch_operands = 0 : i64, tpu.core_type = #tpu.core_type<tc>, window_params = [{transform_indices = @transform_0, window_bounds = array<i64: 16, 1>}, {pipeline_mode = #tpu.pipeline_mode<synchronous>, transform_indices = @transform_1, window_bounds = array<i64: 1, 128>}, {pipeline_mode = #tpu.pipeline_mode<synchronous>, transform_indices = @transform_2, window_bounds = array<i64: 1, 128>}, {pipeline_mode = #tpu.pipeline_mode<synchronous>, transform_indices = @transform_3, window_bounds = array<i64: 128, 128>}, {pipeline_mode = #tpu.pipeline_mode<synchronous>, transform_indices = @transform_4, window_bounds = array<i64: 1, 128>}, {pipeline_mode = #tpu.pipeline_mode<synchronous>, transform_indices = @transform_5, window_bounds = array<i64: 128, 128>}, {pipeline_mode = #tpu.pipeline_mode<synchronous>, transform_indices = @transform_6, window_bounds = array<i64: 1, 128>}, {transform_indices = @transform_7, window_bounds = array<i64: 16, 128>}]} {
    %c0 = arith.constant 0 : index
    %c0_0 = arith.constant 0 : index
    %0 = vector.load %arg1[%c0, %c0_0] : memref<16x1xf32, #tpu.memory_space<vmem>>, vector<16x1xf32>
    %c0_1 = arith.constant 0 : index
    %c0_2 = arith.constant 0 : index
    %1 = vector.load %arg2[%c0_1, %c0_2] : memref<1x128xf32, #tpu.memory_space<vmem>>, vector<1x128xf32>
    %2 = vector.broadcast %0 : vector<16x1xf32> to vector<16x128xf32>
    %3 = vector.broadcast %1 : vector<1x128xf32> to vector<16x128xf32>
    %4 = arith.mulf %2, %3 : vector<16x128xf32>
    %c0_3 = arith.constant 0 : index
    %c0_4 = arith.constant 0 : index
    %5 = vector.load %arg3[%c0_3, %c0_4] : memref<1x128xf32, #tpu.memory_space<vmem>>, vector<1x128xf32>
    %6 = vector.broadcast %5 : vector<1x128xf32> to vector<16x128xf32>
    %7 = arith.addf %4, %6 : vector<16x128xf32>
    %cst = arith.constant 0.000000e+00 : f32
    %8 = vector.broadcast %cst : f32 to vector<16x128xf32>
    %9 = arith.maximumf %7, %8 : vector<16x128xf32>
    %c0_5 = arith.constant 0 : index
    %c0_6 = arith.constant 0 : index
    %10 = vector.load %arg4[%c0_5, %c0_6] : memref<128x128xf32, #tpu.memory_space<vmem>>, vector<128x128xf32>
    %cst_7 = arith.constant dense<0.000000e+00> : vector<16x128xf32>
    %11 = tpu.matmul %9, %10, %cst_7 {dimension_numbers = #tpu.dot_dimension_numbers<[1], [0], [0], [1], [0, 0, 1, 1], [], []>} : vector<16x128xf32>, vector<128x128xf32>, vector<16x128xf32> -> vector<16x128xf32>
    %c0_8 = arith.constant 0 : index
    %c0_9 = arith.constant 0 : index
    %12 = vector.load %arg5[%c0_8, %c0_9] : memref<1x128xf32, #tpu.memory_space<vmem>>, vector<1x128xf32>
    %13 = vector.broadcast %12 : vector<1x128xf32> to vector<16x128xf32>
    %14 = arith.addf %11, %13 : vector<16x128xf32>
    %cst_10 = arith.constant 0.000000e+00 : f32
    %15 = vector.broadcast %cst_10 : f32 to vector<16x128xf32>
    %16 = arith.maximumf %14, %15 : vector<16x128xf32>
    %c0_11 = arith.constant 0 : index
    %c0_12 = arith.constant 0 : index
    %17 = vector.load %arg6[%c0_11, %c0_12] : memref<128x128xf32, #tpu.memory_space<vmem>>, vector<128x128xf32>
    %cst_13 = arith.constant dense<0.000000e+00> : vector<16x128xf32>
    %18 = tpu.matmul %16, %17, %cst_13 {dimension_numbers = #tpu.dot_dimension_numbers<[1], [0], [0], [1], [0, 0, 1, 1], [], []>} : vector<16x128xf32>, vector<128x128xf32>, vector<16x128xf32> -> vector<16x128xf32>
    %c0_14 = arith.constant 0 : index
    %c0_15 = arith.constant 0 : index
    %19 = vector.load %arg7[%c0_14, %c0_15] : memref<1x128xf32, #tpu.memory_space<vmem>>, vector<1x128xf32>
    %20 = vector.broadcast %19 : vector<1x128xf32> to vector<16x128xf32>
    %21 = arith.addf %18, %20 : vector<16x128xf32>
    %c0_16 = arith.constant 0 : index
    %c0_17 = arith.constant 0 : index
    %22 = vector.load %arg8[%c0_16, %c0_17] : memref<16x128xf32, #tpu.memory_space<vmem>>, vector<16x128xf32>
    tpu.vector_store %arg8[%c0_16, %c0_17], %21 {strides = array<i32>} : memref<16x128xf32, #tpu.memory_space<vmem>>, vector<16x128xf32>,
    return
  }
  func.func @transform_0(%arg0: i32) -> (i32, i32) {
    %c0_i32 = arith.constant 0 : i32
    %c0_i32_0 = arith.constant 0 : i32
    return %arg0, %c0_i32 : i32, i32
  }
  func.func @transform_1(%arg0: i32) -> (i32, i32) {
    %c0_i32 = arith.constant 0 : i32
    %c0_i32_0 = arith.constant 0 : i32
    %c0_i32_1 = arith.constant 0 : i32
    return %c0_i32, %c0_i32_0 : i32, i32
  }
  func.func @transform_2(%arg0: i32) -> (i32, i32) {
    %c0_i32 = arith.constant 0 : i32
    %c0_i32_0 = arith.constant 0 : i32
    %c0_i32_1 = arith.constant 0 : i32
    return %c0_i32, %c0_i32_0 : i32, i32
  }
  func.func @transform_3(%arg0: i32) -> (i32, i32) {
    %c0_i32 = arith.constant 0 : i32
    %c0_i32_0 = arith.constant 0 : i32
    %c0_i32_1 = arith.constant 0 : i32
    return %c0_i32, %c0_i32_0 : i32, i32
  }
  func.func @transform_4(%arg0: i32) -> (i32, i32) {
    %c0_i32 = arith.constant 0 : i32
    %c0_i32_0 = arith.constant 0 : i32
    %c0_i32_1 = arith.constant 0 : i32
    return %c0_i32, %c0_i32_0 : i32, i32
  }
  func.func @transform_5(%arg0: i32) -> (i32, i32) {
    %c0_i32 = arith.constant 0 : i32
    %c0_i32_0 = arith.constant 0 : i32
    %c0_i32_1 = arith.constant 0 : i32
    return %c0_i32, %c0_i32_0 : i32, i32
  }
  func.func @transform_6(%arg0: i32) -> (i32, i32) {
    %c0_i32 = arith.constant 0 : i32
    %c0_i32_0 = arith.constant 0 : i32
    %c0_i32_1 = arith.constant 0 : i32
    return %c0_i32, %c0_i32_0 : i32, i32
  }
  func.func @transform_7(%arg0: i32) -> (i32, i32) {
    %c0_i32 = arith.constant 0 : i32
    %c0_i32_0 = arith.constant 0 : i32
    return %arg0, %c0_i32 : i32, i32
  }
}

</mosaic_0001>

<bundles_post_ra>
// kernel: quantile_perceptron_forward.1
= control target key start
LH: loop header
LB: loop body
LE: loop exit
PB: predicated region body
PF: predicated region fallthrough
CT: control target
= control target key end

     0   :  { %v438_v0 = vmov 0   ;;  %s599_s0 = inlined_call_operand.vmem [shape: f32[16,1], index: 0, kind: input, shape index: {}]   ;;  %s600_s3 = inlined_call_operand.vmem [shape: f32[128,128], index: 3, kind: input, shape index: {}]   ;;  %s601_s5 = inlined_call_operand.vmem [shape: f32[128,128], index: 5, kind: input, shape index: {}]   ;;  %s602_s1 = inlined_call_operand.vmem [shape: f32[1,128], index: 1, kind: input, shape index: {}]   ;;  %s603_s2 = inlined_call_operand.vmem [shape: f32[1,128], index: 2, kind: input, shape index: {}]   ;;  %s604_s4 = inlined_call_operand.vmem [shape: f32[1,128], index: 4, kind: input, shape index: {}]   ;;  %s605_s6 = inlined_call_operand.vmem [shape: f32[1,128], index: 6, kind: input, shape index: {}]   ;;  %s606_s7 = inlined_call_operand.vmem [shape: f32[16,128], index: 7, kind: output, shape index: {}]  }
   0x1   :  { %437 = vset.pattern.permute.xlu0 %v438_v0  ;;  %v26_v1 = vld [vmem:[%s599_s0] sm:$0xff]  ;;  %v59_v3 = vld [vmem:[%s600_s3 + $0x8] sm:$0xff]  ;;  %v60_v4 = vld [vmem:[%s600_s3 + $0x10] sm:$0xff] }
   0x2   :  { %v58_v2 = vld [vmem:[%s600_s3] sm:$0xff]  ;;  %31 = vperm.xlu0 %437, %v26_v1   ;;  %v61_v5 = vld [vmem:[%s600_s3 + $0x18] sm:$0xff]  ;;  %v27_v6 = vld [vmem:[%s599_s0 + $0x8] sm:$0xff] }
   0x3   :  { %v372_v7 = vpack.c.bf16 %v59_v3, %v58_v2  ;;  %v376_v8 = vpack.c.bf16 %v61_v5, %v60_v4  ;;  %v62_v9 = vld [vmem:[%s600_s3 + $0x20] sm:$0xff]  ;;  %v63_v10 = vld [vmem:[%s600_s3 + $0x28] sm:$0xff]  ;;  %v64_v12 = vld [vmem:[%s600_s3 + $0x30] sm:$0xff] }
   0x4   :  { %v380_v11 = vpack.c.bf16 %v63_v10, %v62_v9  ;;  %v65_v13 = vld [vmem:[%s600_s3 + $0x38] sm:$0xff]  ;;  %v66_v15 = vld [vmem:[%s600_s3 + $0x40] sm:$0xff]  ;;  %v67_v16 = vld [vmem:[%s600_s3 + $0x48] sm:$0xff] }
   0x5   :  { %373 = vmatprep.subr.bf16.mxu0 %v372_v7  ;;  %v384_v14 = vpack.c.bf16 %v65_v13, %v64_v12  ;;  %v158_v17 = vld [vmem:[%s601_s5] sm:$0xff]  ;;  %v159_v18 = vld [vmem:[%s601_s5 + $0x8] sm:$0xff]  ;;  %v160_v19 = vld [vmem:[%s601_s5 + $0x10] sm:$0xff]  ;;  %v388_v22 = vpack.c.bf16 %v67_v16, %v66_v15 }
   0x6   :  { %36 = vperm.xlu0 %437, %v27_v6   ;;  %375 = vmatpush3.bf16.msra.mxu0 %v372_v7  ;;  %v404_v20 = vpack.c.bf16 %v159_v18, %v158_v17  ;;  %v161_v21 = vld [vmem:[%s601_s5 + $0x18] sm:$0xff]  ;;  %v162_v24 = vld [vmem:[%s601_s5 + $0x20] sm:$0xff]  ;;  %v163_v25 = vld [vmem:[%s601_s5 + $0x28] sm:$0xff] }
   0x7   :  { %377 = vmatprep.subr.bf16.mxu0 %v376_v8  ;;  %v408_v23 = vpack.c.bf16 %v161_v21, %v160_v19  ;;  %v68_v26 = vld [vmem:[%s600_s3 + $0x50] sm:$0xff]  ;;  %v69_v27 = vld [vmem:[%s600_s3 + $0x58] sm:$0xff]  ;;  %v412_v28 = vpack.c.bf16 %v163_v25, %v162_v24  ;;  %v70_v32 = vld [vmem:[%s600_s3 + $0x60] sm:$0xff] }
   0x8   :  { %405 = vmatprep.subr.bf16.mxu1 %v404_v20  ;;  %v392_v29 = vpack.c.bf16 %v69_v27, %v68_v26  ;;  %v164_v30 = vld [vmem:[%s601_s5 + $0x30] sm:$0xff]  ;;  %v165_v31 = vld [vmem:[%s601_s5 + $0x38] sm:$0xff]  ;;  %v71_v33 = vld [vmem:[%s600_s3 + $0x68] sm:$0xff] }
   0x9   :  { %407 = vmatpush3.bf16.msra.mxu1 %v404_v20  ;;  %v416_v34 = vpack.c.bf16 %v165_v31, %v164_v30  ;;  %v396_v35 = vpack.c.bf16 %v71_v33, %v70_v32  ;;  %v166_v36 = vld [vmem:[%s601_s5 + $0x40] sm:$0xff]  ;;  %v167_v37 = vld [vmem:[%s601_s5 + $0x48] sm:$0xff]  ;;  %v72_v38 = vld [vmem:[%s600_s3 + $0x70] sm:$0xff] }
   0xa   :  { %379 = vmatpush3.bf16.msra.mxu0 %v376_v8  ;;  %409 = vmatprep.subr.bf16.mxu1 %v408_v23  ;;  %v73_v39 = vld [vmem:[%s600_s3 + $0x78] sm:$0xff]  ;;  %v420_v40 = vpack.c.bf16 %v167_v37, %v166_v36  ;;  %v168_v42 = vld [vmem:[%s601_s5 + $0x50] sm:$0xff]  ;;  %v170_v45 = vld [vmem:[%s601_s5 + $0x60] sm:$0xff] }
   0xb   :  { %381 = vmatprep.subr.bf16.mxu0 %v380_v11  ;;  %v400_v41 = vpack.c.bf16 %v73_v39, %v72_v38  ;;  %v169_v43 = vld [vmem:[%s601_s5 + $0x58] sm:$0xff]  ;;  %v171_v46 = vld [vmem:[%s601_s5 + $0x68] sm:$0xff]  ;;  %v262_v48 = vld [vmem:[%s602_s1] ss:$0 sm:$0xff] }
   0xc   :  { %v424_v44 = vpack.c.bf16 %v169_v43, %v168_v42  ;;  %v428_v47 = vpack.c.bf16 %v171_v46, %v170_v45  ;;  %v263_v50 = vld [vmem:[%s603_s2] ss:$0 sm:$0xff]  ;;  %v172_v58 = vld [vmem:[%s601_s5 + $0x70] sm:$0xff]  ;;  %v173_v59 = vld [vmem:[%s601_s5 + $0x78] sm:$0xff] }
   0xd   :  { %411 = vmatpush3.bf16.msra.mxu1 %v408_v23  ;;  %v432_v60 = vpack.c.bf16 %v173_v59, %v172_v58  ;;  %v264_v61 = vld [vmem:[%s604_s4] ss:$0 sm:$0xff] }
   0xe   :  { %383 = vmatpush3.bf16.msra.mxu0 %v380_v11  ;;  %413 = vmatprep.subr.bf16.mxu1 %v412_v28  ;;  %v265_v4 = vld [vmem:[%s605_s6] ss:$0 sm:$0xff] }
   0xf   :  { %385 = vmatprep.subr.bf16.mxu0 %v384_v14 }
  0x11   :  { %415 = vmatpush3.bf16.msra.mxu1 %v412_v28 }
  0x12   :  { %387 = vmatpush3.bf16.msra.mxu0 %v384_v14  ;;  %417 = vmatprep.subr.bf16.mxu1 %v416_v34 }
  0x13   :  { %389 = vmatprep.subr.bf16.mxu0 %v388_v22 }
  0x15   :  { %419 = vmatpush3.bf16.msra.mxu1 %v416_v34 }
  0x16   :  { %391 = vmatpush3.bf16.msra.mxu0 %v388_v22  ;;  %421 = vmatprep.subr.bf16.mxu1 %v420_v40 }
  0x17   :  { %393 = vmatprep.subr.bf16.mxu0 %v392_v29 }
  0x19   :  { %423 = vmatpush3.bf16.msra.mxu1 %v420_v40 }
  0x1a   :  { %395 = vmatpush3.bf16.msra.mxu0 %v392_v29  ;;  %425 = vmatprep.subr.bf16.mxu1 %v424_v44 }
  0x1b   :  { %397 = vmatprep.subr.bf16.mxu0 %v396_v35 }
  0x1d   :  { %427 = vmatpush3.bf16.msra.mxu1 %v424_v44 }
  0x1e   :  { %399 = vmatpush3.bf16.msra.mxu0 %v396_v35  ;;  %429 = vmatprep.subr.bf16.mxu1 %v428_v47 }
  0x1f   :  { %401 = vmatprep.subr.bf16.mxu0 %v400_v41 }
  0x21   :  { %431 = vmatpush3.bf16.msra.mxu1 %v428_v47 }
  0x22   :  { %403 = vmatpush3.bf16.msra.mxu0 %v400_v41  ;;  %433 = vmatprep.subr.bf16.mxu1 %v432_v60 }
  0x25   :  { %435 = vmatpush3.bf16.msra.mxu1 %v432_v60 }
  0x81   :  { %v32_v49 = vpop.permute.xlu0 %31 }
  0x82   :  { %v45_v51 = vmul.f32 %v262_v48, %v32_v49 }
  0x84   :  { %v54_v52 = vadd.f32 %v263_v50, %v45_v51 }
  0x85   :  { %v37_v53 = vpop.permute.xlu0 %36 }
  0x86   :  { %v46_v54 = vmul.f32 %v262_v48, %v37_v53  ;;  %v56_v55 = vmax.f32 %v54_v52, 0.0 }
  0x88   :  { %v55_v56 = vadd.f32 %v263_v50, %v46_v54  ;;  %334 = vmatprep.mubr.f32.mxu0 %v56_v55 }
  0x8a   :  { %v57_v57 = vmax.f32 %v55_v56, 0.0 }
  0x8c   :  { %335 = vmatmul.mubr.f32.vlgmr.msra.gmra.mrb[0].mxu0 %v57_v57 }
 0x15f   :  { %v336_v62 = vpop.f32.mrb[0].mxu0 }
 0x160   :  { %v153_v63 = vadd.f32 %v336_v62, %v264_v61  ;;  %v147_v0 = vpop.f32.mrb[1].mxu0 }
 0x161   :  { %v148_v1 = vadd.f32 %v264_v61, %v147_v0 }
 0x162   :  { %v157_v3 = vmax.f32 %v153_v63, 0.0 }
 0x163   :  { %v156_v2 = vmax.f32 %v148_v1, 0.0 }
 0x165   :  { %369 = vmatprep.mubr.f32.mxu1 %v156_v2 }
 0x166   :  { %370 = vmatmul.mubr.f32.vlgmr.msra.gmra.mrb[0].mxu1 %v157_v3 }
 0x239   :  { %v371_v5 = vpop.f32.mrb[0].mxu1 }
 0x23a   :  { %v253_v6 = vadd.f32 %v371_v5, %v265_v4  ;;  %v247_v7 = vpop.f32.mrb[1].mxu1 }
 0x23b   :  { %v248_v8 = vadd.f32 %v265_v4, %v247_v7 }
 0x23c   :  { %257 = vst [vmem:[%s606_s7 + $0x8] sm:$0xff] %v253_v6 }
 0x23d   :  { %256 = vst [vmem:[%s606_s7] sm:$0xff] %v248_v8 }

</bundles_post_ra>
